<compile_context>
chip_gen: v6e
topology: v6e:2x2x1
jax: 0.10.0
libtpu: 0.0.40
codegen_flags: <defaults>
</compile_context>

<pallas_src>
import jax
import jax.numpy as jnp
from jax import lax
from jax.experimental import pallas as pl
from jax.experimental.pallas import tpu as pltpu


def _round_up(x: int, m: int) -> int:
    return (x + m - 1) // m * m


def _sublane_granule(dtype) -> int:
    # Sub-32-bit dtypes pack along sublanes (bf16 native tile is (16, 128)).
    itemsize = jnp.dtype(dtype).itemsize
    return max(8, (4 // itemsize) * 8)


def _score_matmul_kernel(hr_ref, ent_ref, out_ref):
    # (TM, 2R) x (TN, 2R) -> (TM, TN): contract on the shared feature axis so the
    # entity table keeps its natural [N, 2R] layout (no HBM transpose pass),
    # f32 accumulation on the MXU, lane-dense output store.
    out_ref[...] = lax.dot_general(
        hr_ref[...],
        ent_ref[...],
        dimension_numbers=(((1,), (1,)), ((), ())),
        preferred_element_type=jnp.float32,
    ).astype(out_ref.dtype)


def _tiled_scores(hr, ent, *, tm_cap=256, tn_cap=512, out_dtype=jnp.float32):
    """hr: [B, 2R], ent: [N, 2R] (same dtype)  ->  scores [B, N] in out_dtype."""
    B, two_r = hr.shape
    N, two_r_e = ent.shape
    assert two_r == two_r_e, (two_r, two_r_e)

    gm = _sublane_granule(hr.dtype)
    in_bytes = jnp.dtype(hr.dtype).itemsize
    out_bytes = jnp.dtype(out_dtype).itemsize

    # Balanced tiles: if an axis fits in one tile use the full dim (always a legal
    # block shape), otherwise balance so pad waste is at most one granule.
    if B <= tm_cap:
        TM = B
    else:
        TM = _round_up(pl.cdiv(B, pl.cdiv(B, tm_cap)), gm)
    if N <= tn_cap:
        TN = N
    else:
        TN = _round_up(pl.cdiv(N, pl.cdiv(N, tn_cap)), 128)

    # Keep the double-buffered tile footprint within a generation-safe VMEM budget
    # (v7x has only 64 MiB physical); shrink tiles before asking for more VMEM.
    budget = 40 * 1024 * 1024

    def footprint(tm, tn):
        return 2 * (tm * two_r * in_bytes + tn * two_r * in_bytes + tm * tn * out_bytes)

    while footprint(TM, TN) > budget and TN > 128:
        TN = max(128, _round_up(TN - 128, 128))
    while footprint(TM, TN) > budget and TM > gm:
        TM = max(gm, _round_up(TM - gm, gm))
    # TODO(synk): if 2R alone is so large that even minimal tiles blow the budget,
    # add a K grid axis ("arbitrary") with an f32 accumulator scratch + pl.when.

    # Entity axis OUTER, batch axis INNER -> entity tile resident across the inner
    # sweep; the table is read from HBM once.
    grid = (pl.cdiv(N, TN), pl.cdiv(B, TM))

    vmem_limit = min(max(int(footprint(TM, TN) * 1.5) + (4 << 20), 32 << 20), 56 << 20)

    cost = pl.CostEstimate(
        flops=2 * B * two_r * N,
        transcendentals=0,
        bytes_accessed=in_bytes * (B * two_r * grid[0] + N * two_r)
        + out_bytes * B * N,
    )

    return pl.pallas_call(
        _score_matmul_kernel,
        out_shape=jax.ShapeDtypeStruct((B, N), out_dtype),
        grid_spec=pltpu.PrefetchScalarGridSpec(
            num_scalar_prefetch=0,
            grid=grid,
            in_specs=[
                # hr tile: small, re-streamed each inner (batch) step.
                # TODO(synk): pipeline_mode=pl.Buffered(3) here if profiling shows
                # exposed DMA at outer-tile boundaries.
                pl.BlockSpec((TM, two_r), lambda j, i: (i, 0)),
                # entity tile (natural [N, 2R] layout): block index depends only on
                # the OUTER axis, so it stays resident across the inner batch sweep.
                pl.BlockSpec((TN, two_r), lambda j, i: (j, 0)),
            ],
            out_specs=pl.BlockSpec((TM, TN), lambda j, i: (i, j)),
        ),
        compiler_params=pltpu.CompilerParams(
            # Both axes independent; entity axis leading so megacore on v7x shards
            # disjoint halves of the entity table across the two TensorCores.
            dimension_semantics=("parallel", "parallel"),
            vmem_limit_bytes=vmem_limit,
        ),
        cost_estimate=cost,
    )(hr, ent)


def complex_forward_pallas(x, ent_weight, rel_weight, rank,
                           mxu_dtype=jnp.bfloat16, tm_cap=256, tn_cap=512,
                           ent_weight_mxu=None):
    """x: int32 [B,3] triples; ent_weight: [N_ent, 2R]; rel_weight: [N_rel, 2R].

    Returns (scores [B, N_ent] f32, [(|lhs|, |rel|, |rhs|)]) matching the torch module.
    """
    # Embedding lookups (glue, fused by XLA).
    # TODO(synk): could be folded into the kernel with scalar-prefetched indices
    # + pl.Element row gathers; lower priority than tiling/layout, kept in XLA.
    lhs = jnp.take(ent_weight, x[:, 0], axis=0)
    rel = jnp.take(rel_weight, x[:, 1], axis=0)
    rhs = jnp.take(ent_weight, x[:, 2], axis=0)

    l_r, l_i = lhs[:, :rank], lhs[:, rank:]
    r_r, r_i = rel[:, :rank], rel[:, rank:]
    t_r, t_i = rhs[:, :rank], rhs[:, rank:]

    # Complex Hadamard product (f32), concatenated so the kernel does ONE
    # contraction over K = 2R:  hr @ ent.T  ==  hr_R @ e_R.T + hr_I @ e_I.T
    hr = jnp.concatenate([l_r * r_r - l_i * r_i, l_r * r_i + l_i * r_r], axis=1)

    if ent_weight_mxu is None:
        # TODO(synk): in a training/eval loop, hoist this cast out of the per-step
        # jit and pass it via `ent_weight_mxu` so the table is converted once.
        ent_weight_mxu = ent_weight.astype(mxu_dtype)

    scores = _tiled_scores(hr.astype(ent_weight_mxu.dtype), ent_weight_mxu,
                           tm_cap=tm_cap, tn_cap=tn_cap)

    # N3-regularization factors: O(B*R), independent of N -> plain JAX.
    lfac = jnp.sqrt(l_r * l_r + l_i * l_i)
    rfac = jnp.sqrt(r_r * r_r + r_i * r_i)
    tfac = jnp.sqrt(t_r * t_r + t_i * t_i)

    # Matches torch return: (scores, [(lhs_fac, rel_fac, rhs_fac)])
    return scores, [(lfac, rfac, tfac)]


def complex_forward_ref(x, ent_weight, rel_weight, rank, operand_dtype=jnp.float32):
    """Pure-JAX reference. `operand_dtype` mimics the kernel's MXU operand cast."""
    lhs = jnp.take(ent_weight, x[:, 0], axis=0)
    rel = jnp.take(rel_weight, x[:, 1], axis=0)
    rhs = jnp.take(ent_weight, x[:, 2], axis=0)
    l_r, l_i = lhs[:, :rank], lhs[:, rank:]
    r_r, r_i = rel[:, :rank], rel[:, rank:]
    t_r, t_i = rhs[:, :rank], rhs[:, rank:]
    hr = jnp.concatenate([l_r * r_r - l_i * r_i, l_r * r_i + l_i * r_r], axis=1)
    hr = hr.astype(operand_dtype).astype(jnp.float32)
    ent = ent_weight.astype(operand_dtype).astype(jnp.float32)
    scores = jnp.dot(hr, ent.T, precision=lax.Precision.HIGHEST)
    return scores, [(
        jnp.sqrt(l_r ** 2 + l_i ** 2),
        jnp.sqrt(r_r ** 2 + r_i ** 2),
        jnp.sqrt(t_r ** 2 + t_i ** 2),
    )]


def _run_case(key, n_ent, n_rel, rank, B, mxu_dtype, tm_cap=256, tn_cap=512,
              init_size=0.001):
    k_ent, k_rel, k_h, k_r, k_t = jax.random.split(key, 5)
    ent_weight = jax.random.normal(k_ent, (n_ent, 2 * rank), jnp.float32) * init_size
    rel_weight = jax.random.normal(k_rel, (n_rel, 2 * rank), jnp.float32) * init_size
    x = jnp.stack([
        jax.random.randint(k_h, (B,), 0, n_ent),
        jax.random.randint(k_r, (B,), 0, n_rel),
        jax.random.randint(k_t, (B,), 0, n_ent),
    ], axis=1).astype(jnp.int32)

    fwd = jax.jit(complex_forward_pallas,
                  static_argnames=("rank", "mxu_dtype", "tm_cap", "tn_cap"))
    scores, factors = fwd(x, ent_weight, rel_weight, rank=rank,
                          mxu_dtype=mxu_dtype, tm_cap=tm_cap, tn_cap=tn_cap)
    jax.block_until_ready(scores)
    jax.block_until_ready(factors)
    assert scores.shape == (B, n_ent)
    assert scores.dtype == jnp.float32

    # Apples-to-apples reference: same operand dtype, f32 accumulation -> only
    # accumulation-order differences remain.
    scores_ref, factors_ref = complex_forward_ref(
        x, ent_weight, rel_weight, rank, operand_dtype=mxu_dtype)
    assert jnp.allclose(scores, scores_ref, rtol=1e-3, atol=1e-11), (
        float(jnp.max(jnp.abs(scores - scores_ref))))

    # Loose sanity check against the full-precision reference (only meaningful
    # slack needed for the bf16-operand fast path).
    scores_f32, _ = complex_forward_ref(x, ent_weight, rel_weight, rank,
                                        operand_dtype=jnp.float32)
    tol = 0.05 * float(jnp.max(jnp.abs(scores_f32))) + 1e-12
    assert float(jnp.max(jnp.abs(scores - scores_f32))) <= tol

    for got, ref in zip(factors[0], factors_ref[0]):
        assert got.shape == (B, rank)
        assert jnp.allclose(got, ref, atol=1e-7, rtol=1e-5)


if __name__ == "__main__":
    key = jax.random.PRNGKey(0)
    k1, k2, k3 = jax.random.split(key, 3)

    # f32 MXU-operand path (bit-tight check): tile-aligned and ragged shapes.
    _run_case(k1, n_ent=64, n_rel=16, rank=32, B=8, mxu_dtype=jnp.float32)
    _run_case(k2, n_ent=300, n_rel=11, rank=48, B=37, mxu_dtype=jnp.float32)

    # bf16 MXU-operand path (default fast path), small caps to force a multi-tile
    # grid in both axes and exercise the resident-entity-tile pipeline + ragged
    # edge blocks.
    _run_case(k3, n_ent=700, n_rel=11, rank=64, B=300, mxu_dtype=jnp.bfloat16,
              tm_cap=128, tn_cap=256)

    # TODO(synk): the p_hr / p_tr alternate return paths and the filtered-ranking
    # loops (get_ranking / get_ranking2) are host-side / non-default-path code,
    # not part of the scoring forward hot path.
    print("KERNEL_OK")
</pallas_src>

<mosaic_0001>
module attributes {stable_mosaic.version = 11 : i64} {
  func.func @_score_matmul_kernel(%arg0: i32, %arg1: i32, %arg2: memref<8x64xf32, #tpu.memory_space<vmem>>, %arg3: memref<64x64xf32, #tpu.memory_space<vmem>>, %arg4: memref<8x64xf32, #tpu.memory_space<vmem>>) attributes {dimension_semantics = [#tpu.dimension_semantics<parallel>, #tpu.dimension_semantics<parallel>], iteration_bounds = array<i64: 1, 1>, scalar_prefetch = 0 : i64, scratch_operands = 0 : i64, tpu.core_type = #tpu.core_type<tc>, window_params = [{transform_indices = @transform_0, window_bounds = array<i64: 8, 64>}, {transform_indices = @transform_1, window_bounds = array<i64: 64, 64>}, {transform_indices = @transform_2, window_bounds = array<i64: 8, 64>}]} {
    %c0 = arith.constant 0 : index
    %c0_0 = arith.constant 0 : index
    %0 = vector.load %arg2[%c0, %c0_0] : memref<8x64xf32, #tpu.memory_space<vmem>>, vector<8x64xf32>
    %c0_1 = arith.constant 0 : index
    %c0_2 = arith.constant 0 : index
    %1 = vector.load %arg3[%c0_1, %c0_2] : memref<64x64xf32, #tpu.memory_space<vmem>>, vector<64x64xf32>
    %cst = arith.constant dense<0.000000e+00> : vector<8x64xf32>
    %2 = tpu.matmul %0, %1, %cst {dimension_numbers = #tpu.dot_dimension_numbers<[1], [1], [0], [0], [0, 0, 1, 0], [], []>} : vector<8x64xf32>, vector<64x64xf32>, vector<8x64xf32> -> vector<8x64xf32>
    %c0_3 = arith.constant 0 : index
    %c0_4 = arith.constant 0 : index
    %3 = vector.load %arg4[%c0_3, %c0_4] : memref<8x64xf32, #tpu.memory_space<vmem>>, vector<8x64xf32>
    tpu.vector_store %arg4[%c0_3, %c0_4], %2 {strides = array<i32>} : memref<8x64xf32, #tpu.memory_space<vmem>>, vector<8x64xf32>,
    return
  }
  func.func @transform_0(%arg0: i32, %arg1: i32) -> (i32, i32) {
    %c0_i32 = arith.constant 0 : i32
    %c0_i32_0 = arith.constant 0 : i32
    return %arg1, %c0_i32 : i32, i32
  }
  func.func @transform_1(%arg0: i32, %arg1: i32) -> (i32, i32) {
    %c0_i32 = arith.constant 0 : i32
    %c0_i32_0 = arith.constant 0 : i32
    return %arg0, %c0_i32 : i32, i32
  }
  func.func @transform_2(%arg0: i32, %arg1: i32) -> (i32, i32) {
    %c0_i32 = arith.constant 0 : i32
    return %arg1, %arg0 : i32, i32
  }
}

</mosaic_0001>

<bundles_post_ra>
// kernel: complex_forward_pallas.1
= control target key start
LH: loop header
LB: loop body
LE: loop exit
PB: predicated region body
PF: predicated region fallthrough
CT: control target
= control target key end

     0   :  { %vm21_vm0 = vcmask 523264   ;;  %v196_v1 = vmov 0.0   ;;  %vm197_vm1 = vmmov 0   ;;  %s254_s0 = inlined_call_operand.vmem [shape: f32[8,64], index: 0, kind: input, shape index: {}]   ;;  %s255_s1 = inlined_call_operand.vmem [shape: f32[64,64], index: 1, kind: input, shape index: {}]   ;;  %s256_s2 = inlined_call_operand.hbm [shape: f32[8,64], index: 2, kind: output, shape index: {}]  }
   0x1   :  { %v20_v0 = vld [vmem:[%s255_s1 + $0x38] sm:$0xff]  ;;  %152 = vmatprep.subr.mxu0 %v196_v1  ;;  %168 = vmatprep.mubr.msk.f32.mxu0 %vm197_vm1, %v196_v1  ;;  %v19_v2 = vld [vmem:[%s255_s1 + $0x30] sm:$0xff] }
   0x2   :  { %153 = vmatpush3.xpose.msk.msra.mxu0 %vm21_vm0, %v20_v0 }
   0x3   :  { %154 = vmatprep.subr.mxu0 %v196_v1 }
   0x4   :  { %7 = vsyncpa [#allocation3], 0  ;;  %v18_v3 = vld [vmem:[%s255_s1 + $0x28] sm:$0xff]  ;;  %v17_v4 = vld [vmem:[%s255_s1 + $0x20] sm:$0xff]  ;;  %s198_s27 = smov [#allocation2]  }
   0x5   :  { %v16_v5 = vld [vmem:[%s255_s1 + $0x18] sm:$0xff]  ;;  %v15_v6 = vld [vmem:[%s255_s1 + $0x10] sm:$0xff]  ;;  %v14_v7 = vld [vmem:[%s255_s1 + $0x8] sm:$0xff]  ;;  %s126_s28 = sshll.u32 %s198_s27, 4  ;;  %s127_s28 = int_to_ptr.vmem [resolvable:$true] %s126_s28 }
   0x6   :  { %155 = vmatpush3.xpose.msk.msra.mxu0 %vm21_vm0, %v19_v2  ;;  %v13_v8 = vld [vmem:[%s255_s1] sm:$0xff]  ;;  %s174_s29 = scalar_lea.vmem %s127_s28, 128  ;;  %p179_p1 = scmp.lt.s32.totalorder %s127_s28, %s127_s28 }
   0x7   :  { %156 = vmatprep.subr.mxu0 %v196_v1  ;;  %v12_v9 = vld [vmem:[%s254_s0] sm:$0xff]  ;;  %p175_p0 = scmp.ne.s32.totalorder %s127_s28, %s174_s29  ;;  %p180_p2 = scmp.lt.s32.totalorder %s174_s29, %s174_s29 }
   0x9   :  { %p181_p3 = por %p180_p2, %p179_p1 }
   0xa   :  { %157 = vmatpush3.xpose.msk.msra.mxu0 %vm21_vm0, %v18_v3 }
   0xb   :  { %158 = vmatprep.subr.mxu0 %v196_v1  ;;  %p182_p4 = pnand %p181_p3, %p175_p0 }
   0xe   :  { %159 = vmatpush3.xpose.msk.msra.mxu0 %vm21_vm0, %v17_v4 }
   0xf   :  { %160 = vmatprep.subr.mxu0 %v196_v1 }
  0x12   :  { %161 = vmatpush3.xpose.msk.msra.mxu0 %vm21_vm0, %v16_v5 }
  0x13   :  { %162 = vmatprep.subr.mxu0 %v196_v1 }
  0x16   :  { %163 = vmatpush3.xpose.msk.msra.mxu0 %vm21_vm0, %v15_v6 }
  0x17   :  { %164 = vmatprep.subr.mxu0 %v196_v1 }
  0x1a   :  { %165 = vmatpush3.xpose.msk.msra.mxu0 %vm21_vm0, %v14_v7 }
  0x1b   :  { %166 = vmatprep.subr.mxu0 %v196_v1 }
  0x1e   :  { %167 = vmatpush3.xpose.msk.msra.mxu0 %vm21_vm0, %v13_v8 }
  0x21   :  { %169 = vmatmul.mubr.msk.f32.vlgmr.msra.gmra.mxu0 %vm21_vm0, %v12_v9 }
  0xe1   :  { %v115_v10 = vpop.f32.mrf.mxu0 }
  0xe2   :  { %119 = vst.msk [vmem:[#allocation2] sm:$0xff] %vm21_vm0, %v115_v10 }
  0xe3   :  { %v170_v11 = vpop.f32.mrf.mxu0 }
  0xe4   :  { %185 = shalt.err (!%p182_p4)
}
  0xe5   :  { %129 = dma.vmem_to_hbm [thread:$0]  %s127_s28, 128, %s256_s2, [#allocation3]  }
  0xe6   :  { %194 = dma.done.wait [#allocation3], 128  }
  0xe7   :  { %195 = vsyncadd [#allocation3], 4294967168 }
  0xe8   :  { %133 = vsyncpa [#allocation3], 1 }

</bundles_post_ra>
